<compile_context>
chip_gen: v6e
topology: v6e:2x2x1
jax: 0.10.0
libtpu: 0.0.40
codegen_flags: <defaults>
</compile_context>

<pallas_src>
import functools

import jax
import jax.numpy as jnp
from jax.experimental import pallas as pl
from jax.experimental.pallas import tpu as pltpu


def _fold_band_weights(weights, W, dtype):
    """[NH, K, K, Cin, Cout] (HWIO per hybrid) -> [NH, K*W*Cin, W*Cout].

    Width + input channels are folded into a banded matrix (kw taps become a
    band over the W*Cin rows), and the K height taps (kh) are folded into the
    contraction dim, so each hybrid needs exactly one MXU matmul per sample
    block. Contraction index = kh*W*Cin + w_in*Cin + ci, matching the
    in-kernel LHS layout.
    """
    NH, K, Kw, Cin, Cout = weights.shape
    pad = (Kw - 1) // 2
    w_in = jnp.arange(W)[:, None]                                    # [W, 1]
    w_out = jnp.arange(W)[None, :]                                   # [1, W]
    kw = w_in - w_out + pad                                          # [W, W]
    onehot = (kw[..., None] == jnp.arange(Kw)).astype(weights.dtype)  # [W, W, Kw]
    wb = jnp.einsum("pqk,nhkio->nhpiqo", onehot, weights)  # [NH, K, W, Cin, W, Cout]
    return wb.reshape(NH, K * W * Cin, W * Cout).astype(dtype)


def _hybrid_head_kernel(x_ref, sel_ref, w_ref, b_ref, o_ref, *, H):
    """One grid step processes a block of B = BH // H samples.

    x_ref  : VMEM [B*H, W*Cin]           lane-dense activations (f32)
    sel_ref: VMEM [B*H, NH]              per-row one-hot hybrid selector (f32)
    w_ref  : VMEM [NH, K*W*Cin, W*Cout]  kh-folded banded weights, all hybrids
    b_ref  : VMEM [NH, W*Cout]           width-tiled biases, all hybrids
    o_ref  : VMEM [B*H, W*Cout]          lane-dense output
    """
    BH, WC = x_ref.shape
    NH, KWC, WO = w_ref.shape
    K = KWC // WC
    pad = (K - 1) // 2

    # MXU operand dtype follows the weights (bf16 in production, f32 here).
    x = x_ref[...].astype(w_ref.dtype)                         # [B*H, WC]

    # Per-row height index within its own sample (samples stacked along rows).
    row = jax.lax.broadcasted_iota(jnp.int32, (BH, 1), 0) % H

    # kh-folded LHS [B*H, K*WC]: chunk kh holds rows shifted by (kh - pad)
    # within each sample; rows that would cross a sample boundary are zeroed
    # (SAME padding). No halo staging buffer, no extra VMEM->VMEM pass.
    chunks = []
    for kh in range(K):
        d = kh - pad
        if d == 0:
            chunks.append(x)
        elif d < 0:
            shifted = jnp.concatenate(
                [jnp.zeros((-d, WC), x.dtype), x[: BH + d, :]], axis=0)
            chunks.append(jnp.where(row >= -d, shifted, jnp.zeros((), x.dtype)))
        else:
            shifted = jnp.concatenate(
                [x[d:, :], jnp.zeros((d, WC), x.dtype)], axis=0)
            chunks.append(jnp.where(row < H - d, shifted, jnp.zeros((), x.dtype)))
    lhs = jnp.concatenate(chunks, axis=-1)                     # [B*H, K*WC]

    sel = sel_ref[...]                                         # [B*H, NH]

    # Accumulator initialized with the per-row selected bias (tiny matmul,
    # no separate full-size bias add afterwards).
    acc = jnp.dot(sel, b_ref[...], preferred_element_type=jnp.float32)  # [B*H, WO]

    # Compute against every hybrid (NH tiny) and masked-accumulate with the
    # one-hot selector: keeps M = B*H per matmul and avoids any dynamically
    # indexed weight reads.
    for h in range(NH):
        y = jnp.dot(lhs, w_ref[h], preferred_element_type=jnp.float32)
        acc = acc + sel[:, h:h + 1] * y
    o_ref[...] = acc.astype(o_ref.dtype)


def _pick_samples_per_block(N, H):
    # Aim for M = B*H ~ 256 rows per MXU matmul, but keep >= 2 grid steps when
    # N > 1 so the "parallel" batch axis can shard across both TensorCores on
    # dual-core parts (v7x).
    B = max(1, min(N, 256 // max(H, 1)))
    if N > 1:
        B = max(1, min(B, (N + 1) // 2))
    return B


@jax.jit
def _hybrid_head_forward(x_nchw, h_ids, wb, bt):
    N, Cin, H, W = x_nchw.shape
    NH, KWC, WO = wb.shape
    Cout = WO // W

    B = _pick_samples_per_block(N, H)
    G = -(-N // B)
    Npad = G * B

    # NCHW -> lane-dense rows [N*H, W*Cin] (layout glue, fused under jit).
    x_rows = jnp.transpose(x_nchw, (0, 2, 3, 1)).reshape(N, H, W * Cin)
    # One-hot hybrid selector per sample. Out-of-range ids select nothing
    # (zero output) instead of causing out-of-bounds weight reads.
    sel = (h_ids[:, None] == jnp.arange(NH, dtype=h_ids.dtype)).astype(jnp.float32)
    if Npad != N:
        x_rows = jnp.pad(x_rows, ((0, Npad - N), (0, 0), (0, 0)))
        sel = jnp.pad(sel, ((0, Npad - N), (0, 0)))
    x_rows = x_rows.reshape(Npad * H, W * Cin)
    sel_rows = jnp.repeat(sel, H, axis=0)                      # [Npad*H, NH]

    out_rows = pl.pallas_call(
        functools.partial(_hybrid_head_kernel, H=H),
        out_shape=jax.ShapeDtypeStruct((Npad * H, WO), jnp.float32),
        grid_spec=pltpu.PrefetchScalarGridSpec(
            num_scalar_prefetch=0,
            grid=(G,),
            in_specs=[
                # one [B*H, W*Cin] activation block per step (single DMA)
                pl.BlockSpec((B * H, W * Cin), lambda i: (i, 0)),
                pl.BlockSpec((B * H, NH), lambda i: (i, 0)),
                # all hybrids' folded weights / biases: constant index map ->
                # fetched once and kept VMEM-resident across the grid.
                # (pipeline_mode=pl.Buffered(1) would also drop the redundant
                #  second buffer; left at default for broad compatibility.)
                pl.BlockSpec((NH, KWC, WO), lambda i: (0, 0, 0)),
                pl.BlockSpec((NH, WO), lambda i: (0, 0)),
            ],
            out_specs=pl.BlockSpec((B * H, WO), lambda i: (i, 0)),
        ),
        compiler_params=pltpu.CompilerParams(
            dimension_semantics=("parallel",)),
    )(x_rows, sel_rows, wb, bt)

    out = out_rows.reshape(Npad, H, W, Cout)[:N]
    return jnp.transpose(out, (0, 3, 1, 2))                    # back to NCHW


class HybridHeadPallas:
    """Pallas port of HybridHead(basic_head=Conv2d(Cin,Cout,3,pad=1), num_hybrids)."""

    def __init__(self, num_hybrids, Cin, Cout, K=3, constant_id=None,
                 key=None, mxu_dtype=jnp.float32):
        if num_hybrids < 2:
            raise ValueError("num_hybrids must be >= 2")
        self.num_hybrids = num_hybrids
        self.constant_id = constant_id
        self.mxu_dtype = mxu_dtype
        key = key if key is not None else jax.random.PRNGKey(0)
        kw_, kb_ = jax.random.split(key)
        # Independent parameters per hybrid (mirrors copy.deepcopy of the head).
        self.weights = 0.1 * jax.random.normal(
            kw_, (num_hybrids, K, K, Cin, Cout), dtype=jnp.float32)
        self.biases = 0.1 * jax.random.normal(
            kb_, (num_hybrids, Cout), dtype=jnp.float32)
        self._cache = {}  # spatial width W -> (folded banded weights, tiled biases)

    def _params_for_width(self, W):
        # Banded-weight construction runs once per width and is cached, so the
        # jitted forward contains only transposes + padding + the kernel.
        if W not in self._cache:
            wb = _fold_band_weights(self.weights, W, self.mxu_dtype)
            bt = jnp.tile(self.biases, (1, W))                 # [NH, W*Cout]
            self._cache[W] = (wb, bt)
        return self._cache[W]

    def __call__(self, x_nchw, h=None):
        N, _, _, W = x_nchw.shape
        if h is None:
            if not isinstance(self.constant_id, int):
                raise ValueError("hybrid id required when constant_id is unset")
            h = [self.constant_id] * N
        h_ids = jnp.asarray(h, dtype=jnp.int32)
        wb, bt = self._params_for_width(W)
        return _hybrid_head_forward(x_nchw, h_ids, wb, bt)


def _reference(x_nchw, h_list, weights, biases):
    """Pure-JAX reference of the routed conv head (per-sample weight select)."""
    x_nhwc = jnp.transpose(x_nchw, (0, 2, 3, 1))
    outs = []
    for i in range(x_nchw.shape[0]):
        w = weights[int(h_list[i])]          # [K, K, Cin, Cout] (HWIO)
        b = biases[int(h_list[i])]
        y = jax.lax.conv_general_dilated(
            x_nhwc[i:i + 1], w, window_strides=(1, 1), padding="SAME",
            dimension_numbers=("NHWC", "HWIO", "NHWC"))
        outs.append(y + b[None, None, None, :])
    out = jnp.concatenate(outs, axis=0)
    return jnp.transpose(out, (0, 3, 1, 2))


if __name__ == "__main__":
    key = jax.random.PRNGKey(0)
    kx, kp = jax.random.split(key)

    N, Cin, H, W = 2, 4, 16, 16
    Cout, num_hybrids = 8, 3

    x = jax.random.normal(kx, (N, Cin, H, W), dtype=jnp.float32)
    h = [2, 0]  # per-sample hybrid ids

    head = HybridHeadPallas(num_hybrids, Cin, Cout, K=3, constant_id=1, key=kp)

    out = jax.block_until_ready(head(x, h))
    ref = _reference(x, h, head.weights, head.biases)
    assert out.shape == (N, Cout, H, W)
    assert jnp.allclose(out, ref, atol=1e-4, rtol=1e-4)

    # constant_id path (h omitted)
    out_const = jax.block_until_ready(head(x))
    ref_const = _reference(x, [1] * N, head.weights, head.biases)
    assert out_const.shape == (N, Cout, H, W)
    assert jnp.allclose(out_const, ref_const, atol=1e-4, rtol=1e-4)

    # bf16 MXU operands (production choice on v5e/v6e/v7x), f32 accumulation.
    head_bf16 = HybridHeadPallas(num_hybrids, Cin, Cout, K=3, constant_id=1,
                                 key=kp, mxu_dtype=jnp.bfloat16)
    out_bf16 = jax.block_until_ready(head_bf16(x, h))
    assert jnp.allclose(out_bf16, ref, atol=2e-2, rtol=2e-2)

    print("KERNEL_OK")
</pallas_src>

<mosaic_0001>
module attributes {stable_mosaic.version = 11 : i64} {
  func.func @_hybrid_head_kernel(%arg0: i32, %arg1: memref<16x64xf32, #tpu.memory_space<vmem>>, %arg2: memref<16x3xf32, #tpu.memory_space<vmem>>, %arg3: memref<3x192x128xf32, #tpu.memory_space<vmem>>, %arg4: memref<3x128xf32, #tpu.memory_space<vmem>>, %arg5: memref<16x128xf32, #tpu.memory_space<vmem>>) attributes {dimension_semantics = [#tpu.dimension_semantics<parallel>], iteration_bounds = array<i64: 2>, scalar_prefetch = 0 : i64, scratch_operands = 0 : i64, tpu.core_type = #tpu.core_type<tc>, window_params = [{transform_indices = @transform_0, window_bounds = array<i64: 16, 64>}, {transform_indices = @transform_1, window_bounds = array<i64: 16, 3>}, {pipeline_mode = #tpu.pipeline_mode<synchronous>, transform_indices = @transform_2, window_bounds = array<i64: 3, 192, 128>}, {pipeline_mode = #tpu.pipeline_mode<synchronous>, transform_indices = @transform_3, window_bounds = array<i64: 3, 128>}, {transform_indices = @transform_4, window_bounds = array<i64: 16, 128>}]} {
    %c0 = arith.constant 0 : index
    %c0_0 = arith.constant 0 : index
    %0 = vector.load %arg1[%c0, %c0_0] : memref<16x64xf32, #tpu.memory_space<vmem>>, vector<16x64xf32>
    %1 = tpu.iota {dimensions = array<i32: 0>} : vector<16x1xi32>
    %c16_i32 = arith.constant 16 : i32
    %c0_i32 = arith.constant 0 : i32
    %2 = arith.cmpi eq, %c16_i32, %c0_i32 : i32
    %c1_i32 = arith.constant 1 : i32
    %3 = arith.select %2, %c1_i32, %c16_i32 : i32
    %4 = vector.broadcast %3 : i32 to vector<16x1xi32>
    %5 = arith.remsi %1, %4 : vector<16x1xi32>
    %c0_i32_1 = arith.constant 0 : i32
    %6 = vector.broadcast %c0_i32_1 : i32 to vector<16x1xi32>
    %7 = arith.cmpi ne, %5, %6 : vector<16x1xi32>
    %c0_i32_2 = arith.constant 0 : i32
    %8 = vector.broadcast %c0_i32_2 : i32 to vector<16x1xi32>
    %9 = arith.cmpi slt, %5, %8 : vector<16x1xi32>
    %c0_i32_3 = arith.constant 0 : i32
    %10 = arith.cmpi slt, %3, %c0_i32_3 : i32
    %11 = vector.broadcast %10 : i1 to vector<16x1xi1>
    %12 = vector.broadcast %11 : vector<16x1xi1> to vector<16x1xi1>
    %13 = arith.xori %9, %12 : vector<16x1xi1>
    %14 = arith.andi %13, %7 : vector<16x1xi1>
    %15 = vector.broadcast %3 : i32 to vector<16x1xi32>
    %16 = arith.addi %5, %15 : vector<16x1xi32>
    %17 = arith.select %14, %16, %5 : vector<16x1xi1>, vector<16x1xi32>
    %cst = arith.constant 0.000000e+00 : f32
    %18 = vector.broadcast %cst : f32 to vector<1x64xf32>
    %19 = vector.extract_strided_slice %0 {offsets = [0, 0], sizes = [15, 64], strides = [1, 1]} : vector<16x64xf32> to vector<15x64xf32>
    %20 = tpu.concatenate %18, %19 in 0 : vector<1x64xf32>, vector<15x64xf32> -> vector<16x64xf32>
    %c1_i32_4 = arith.constant 1 : i32
    %21 = vector.broadcast %c1_i32_4 : i32 to vector<16x1xi32>
    %22 = arith.cmpi sge, %17, %21 : vector<16x1xi32>
    %cst_5 = arith.constant 0.000000e+00 : f32
    %23 = vector.shape_cast %22 : vector<16x1xi1> to vector<16x1xi1>
    %24 = vector.broadcast %23 : vector<16x1xi1> to vector<16x64xi1>
    %25 = vector.broadcast %cst_5 : f32 to vector<16x64xf32>
    %26 = arith.select %24, %20, %25 : vector<16x64xi1>, vector<16x64xf32>
    %27 = vector.extract_strided_slice %0 {offsets = [1, 0], sizes = [15, 64], strides = [1, 1]} : vector<16x64xf32> to vector<15x64xf32>
    %cst_6 = arith.constant 0.000000e+00 : f32
    %28 = vector.broadcast %cst_6 : f32 to vector<1x64xf32>
    %29 = tpu.concatenate %27, %28 in 0 : vector<15x64xf32>, vector<1x64xf32> -> vector<16x64xf32>
    %c15_i32 = arith.constant 15 : i32
    %30 = vector.broadcast %c15_i32 : i32 to vector<16x1xi32>
    %31 = arith.cmpi slt, %17, %30 : vector<16x1xi32>
    %cst_7 = arith.constant 0.000000e+00 : f32
    %32 = vector.shape_cast %31 : vector<16x1xi1> to vector<16x1xi1>
    %33 = vector.broadcast %32 : vector<16x1xi1> to vector<16x64xi1>
    %34 = vector.broadcast %cst_7 : f32 to vector<16x64xf32>
    %35 = arith.select %33, %29, %34 : vector<16x64xi1>, vector<16x64xf32>
    %36 = tpu.concatenate %26, %0, %35 in 1 : vector<16x64xf32>, vector<16x64xf32>, vector<16x64xf32> -> vector<16x192xf32>
    %c0_8 = arith.constant 0 : index
    %c0_9 = arith.constant 0 : index
    %37 = vector.load %arg2[%c0_8, %c0_9] : memref<16x3xf32, #tpu.memory_space<vmem>>, vector<16x3xf32>
    %c0_10 = arith.constant 0 : index
    %c0_11 = arith.constant 0 : index
    %38 = vector.load %arg4[%c0_10, %c0_11] : memref<3x128xf32, #tpu.memory_space<vmem>>, vector<3x128xf32>
    %cst_12 = arith.constant dense<0.000000e+00> : vector<16x128xf32>
    %39 = tpu.matmul %37, %38, %cst_12 {dimension_numbers = #tpu.dot_dimension_numbers<[1], [0], [0], [1], [0, 0, 1, 1], [], []>} : vector<16x3xf32>, vector<3x128xf32>, vector<16x128xf32> -> vector<16x128xf32>
    %c0_13 = arith.constant 0 : index
    %c0_14 = arith.constant 0 : index
    %c0_15 = arith.constant 0 : index
    %40 = vector.load %arg3[%c0_13, %c0_14, %c0_15] : memref<3x192x128xf32, #tpu.memory_space<vmem>>, vector<1x192x128xf32>
    %41 = vector.shape_cast %40 : vector<1x192x128xf32> to vector<192x128xf32>
    %cst_16 = arith.constant dense<0.000000e+00> : vector<16x128xf32>
    %42 = tpu.matmul %36, %41, %cst_16 {dimension_numbers = #tpu.dot_dimension_numbers<[1], [0], [0], [1], [0, 0, 1, 1], [], []>} : vector<16x192xf32>, vector<192x128xf32>, vector<16x128xf32> -> vector<16x128xf32>
    %43 = vector.extract_strided_slice %37 {offsets = [0, 0], sizes = [16, 1], strides = [1, 1]} : vector<16x3xf32> to vector<16x1xf32>
    %44 = vector.broadcast %43 : vector<16x1xf32> to vector<16x128xf32>
    %45 = arith.mulf %44, %42 : vector<16x128xf32>
    %46 = arith.addf %39, %45 : vector<16x128xf32>
    %c1 = arith.constant 1 : index
    %c0_17 = arith.constant 0 : index
    %c0_18 = arith.constant 0 : index
    %47 = vector.load %arg3[%c1, %c0_17, %c0_18] : memref<3x192x128xf32, #tpu.memory_space<vmem>>, vector<1x192x128xf32>
    %48 = vector.shape_cast %47 : vector<1x192x128xf32> to vector<192x128xf32>
    %cst_19 = arith.constant dense<0.000000e+00> : vector<16x128xf32>
    %49 = tpu.matmul %36, %48, %cst_19 {dimension_numbers = #tpu.dot_dimension_numbers<[1], [0], [0], [1], [0, 0, 1, 1], [], []>} : vector<16x192xf32>, vector<192x128xf32>, vector<16x128xf32> -> vector<16x128xf32>
    %50 = vector.extract_strided_slice %37 {offsets = [0, 1], sizes = [16, 1], strides = [1, 1]} : vector<16x3xf32> to vector<16x1xf32>
    %51 = vector.broadcast %50 : vector<16x1xf32> to vector<16x128xf32>
    %52 = arith.mulf %51, %49 : vector<16x128xf32>
    %53 = arith.addf %46, %52 : vector<16x128xf32>
    %c2 = arith.constant 2 : index
    %c0_20 = arith.constant 0 : index
    %c0_21 = arith.constant 0 : index
    %54 = vector.load %arg3[%c2, %c0_20, %c0_21] : memref<3x192x128xf32, #tpu.memory_space<vmem>>, vector<1x192x128xf32>
    %55 = vector.shape_cast %54 : vector<1x192x128xf32> to vector<192x128xf32>
    %cst_22 = arith.constant dense<0.000000e+00> : vector<16x128xf32>
    %56 = tpu.matmul %36, %55, %cst_22 {dimension_numbers = #tpu.dot_dimension_numbers<[1], [0], [0], [1], [0, 0, 1, 1], [], []>} : vector<16x192xf32>, vector<192x128xf32>, vector<16x128xf32> -> vector<16x128xf32>
    %57 = vector.extract_strided_slice %37 {offsets = [0, 2], sizes = [16, 1], strides = [1, 1]} : vector<16x3xf32> to vector<16x1xf32>
    %58 = vector.broadcast %57 : vector<16x1xf32> to vector<16x128xf32>
    %59 = arith.mulf %58, %56 : vector<16x128xf32>
    %60 = arith.addf %53, %59 : vector<16x128xf32>
    %c0_23 = arith.constant 0 : index
    %c0_24 = arith.constant 0 : index
    %61 = vector.load %arg5[%c0_23, %c0_24] : memref<16x128xf32, #tpu.memory_space<vmem>>, vector<16x128xf32>
    tpu.vector_store %arg5[%c0_23, %c0_24], %60 {strides = array<i32>} : memref<16x128xf32, #tpu.memory_space<vmem>>, vector<16x128xf32>,
    return
  }
  func.func @transform_0(%arg0: i32) -> (i32, i32) {
    %c0_i32 = arith.constant 0 : i32
    %c0_i32_0 = arith.constant 0 : i32
    return %arg0, %c0_i32 : i32, i32
  }
  func.func @transform_1(%arg0: i32) -> (i32, i32) {
    %c0_i32 = arith.constant 0 : i32
    %c0_i32_0 = arith.constant 0 : i32
    return %arg0, %c0_i32 : i32, i32
  }
  func.func @transform_2(%arg0: i32) -> (i32, i32, i32) {
    %c0_i32 = arith.constant 0 : i32
    %c0_i32_0 = arith.constant 0 : i32
    %c0_i32_1 = arith.constant 0 : i32
    %c0_i32_2 = arith.constant 0 : i32
    return %c0_i32, %c0_i32_0, %c0_i32_1 : i32, i32, i32
  }
  func.func @transform_3(%arg0: i32) -> (i32, i32) {
    %c0_i32 = arith.constant 0 : i32
    %c0_i32_0 = arith.constant 0 : i32
    %c0_i32_1 = arith.constant 0 : i32
    return %c0_i32, %c0_i32_0 : i32, i32
  }
  func.func @transform_4(%arg0: i32) -> (i32, i32) {
    %c0_i32 = arith.constant 0 : i32
    %c0_i32_0 = arith.constant 0 : i32
    return %arg0, %c0_i32 : i32, i32
  }
}

</mosaic_0001>

<bundles_post_ra>
// kernel: _hybrid_head_forward.1
= control target key start
LH: loop header
LB: loop body
LE: loop exit
PB: predicated region body
PF: predicated region fallthrough
CT: control target
= control target key end

     0   :  { %s973_s15 = smov 0   ;;  %s1383_s0 = inlined_call_operand.vmem [shape: f32[32,64], index: 0, kind: input, shape index: {}]   ;;  %s1384_s1 = inlined_call_operand.vmem [shape: f32[32,3], index: 1, kind: input, shape index: {}]   ;;  %s1385_s2 = inlined_call_operand.vmem [shape: f32[3,192,128], index: 2, kind: input, shape index: {}]   ;;  %s1386_s3 = inlined_call_operand.vmem [shape: f32[3,128], index: 3, kind: input, shape index: {}]   ;;  %s1387_s4 = inlined_call_operand.vmem [shape: f32[32,128], index: 4, kind: output, shape index: {}]  }
   0x1 LB: > { %s791_s16 = sadd.s32 4294967295, %s941_s15   ;;  %p795_p0 = scmp.ge.s32.totalorder %s941_s15, 1  ;;  %s941_s15 = sphi %s973_s15, %s14_s15  }
   0x2   : > { %p174_p1 = scmp.lt.s32.totalorder %s941_s15, 3 }
   0x4   : > { %p175_p2 = pnand %p795_p0, %p174_p1 }
   0x5   : > { %s796_s17 = sshll.u32 (!%p175_p2), %s791_s16, 1  ;;  %s944_s11 = smov (!%p175_p2), 64  }
   0x6   : > { %178 = sbr.rel (%p175_p2) target bundleno = 381 (0x17d), region = 36  ;;  %p206_p3 = scmp.lt.s32.totalorder (!%p175_p2), %s796_s17, 3 }
   0xb   : > { %v295_v0 = vld [vmem:[%s1386_s3] sm:$0x7]  ;;  %vm418_vm0 = vcmask 1042432   ;;  %v311_v1 = vld [vmem:[%s1385_s2 + $0x78] sm:$0xff]  ;;  %v943_v2 = vmov 0.0   ;;  %v310_v3 = vld [vmem:[%s1385_s2 + $0x70] sm:$0xff] }
   0xc   : > { %864 = vmatprep.subr.msk.mxu1 %vm418_vm0, %v295_v0  ;;  %326 = vmatprep.subr.mxu0 %v943_v2  ;;  %s1389_s17 = smov (!%p206_p3, %s796_s17), 3  ;;  %v309_v4 = vld [vmem:[%s1385_s2 + $0x68] sm:$0xff]  ;;  %vm413_vm1 = vcmask 23552   ;;  %v822_v5 = vld [vmem:[%s1385_s2 + $0x138] sm:$0xff]  ;;  %v308_v6 = vld [vmem:[%s1385_s2 + $0x60] sm:$0xff]  ;;  %vm269_vm2 = vcmask 1046528  }
   0xd   : > { %865 = vmatpush3.msk.msra.mxu1 %vm418_vm0, %v295_v0  ;;  %327 = vmatpush1.msra.mxu0 %v311_v1  ;;  %s996_s26 = sshll.u32 %s1389_s17, 3  ;;  %v821_v14 = vld [vmem:[%s1385_s2 + $0x130] sm:$0xff]  ;;  %vm254_vm3 = vcmask 1040384   ;;  %v307_v15 = vld [vmem:[%s1385_s2 + $0x58] sm:$0xff]  ;;  %v820_v18 = vld [vmem:[%s1385_s2 + $0x128] sm:$0xff]  ;;  %vm290_vm4 = vcmask 523264   ;;  %v225_v0 = vlaneseq }
   0xe   : > { %522 = vmatprep.subr.mxu1 %v943_v2  ;;  %328 = vmatprep.subr.mxu0 %v943_v2  ;;  %s209_s29 = scalar_lea.vmem %s1383_s0, %s996_s26  ;;  %s215_s6 = scalar_lea.vmem %s1384_s1, %s996_s26  ;;  %v306_v19 = vld [vmem:[%s1385_s2 + $0x50] sm:$0xff]  ;;  %v819_v20 = vld [vmem:[%s1385_s2 + $0x120] sm:$0xff]  ;;  %v305_v21 = vld [vmem:[%s1385_s2 + $0x48] sm:$0xff]  ;;  %v945_v61 = vmov 0   ;;  %v946_v62 = vmov 1   ;;  %v947_v63 = vmov 2  }
   0xf   : > { %329 = vmatpush1.msra.mxu0 %v310_v3  ;;  %v1013_v7 = vld [vmem:[%s209_s29] sm:$0xff]  ;;  %v1015_v8 = vld [vmem:[%s209_s29 + $0x8] sm:$0xff]  ;;  %v818_v22 = vld [vmem:[%s1385_s2 + $0x118] sm:$0xff]  ;;  %930 = vset.pattern.permute.xlu1 %v945_v61  ;;  %v226_v1 = vshrl.u32 %v225_v0, 7  ;;  %s221_s30 = scalar_lea.vmem %s1387_s4, %s996_s26 }
  0x10   : > { %330 = vmatprep.subr.mxu0 %v943_v2  ;;  %v1017_v9 = vld [vmem:[%s215_s6] sm:$0xff]  ;;  %284 = vrot.lane.b32.xlu0 %v1013_v7, %s944_s11  ;;  %v255_v10 = vrot.slane %v1013_v7, 7  ;;  %v256_v11 = vrot.slane %v1015_v8, 7  ;;  %v271_v12 = vrot.slane %v1015_v8, 1  ;;  %v1025_v13 = vld [vmem:[%s215_s6 + $0x8] sm:$0xff]  ;;  %v817_v24 = vld [vmem:[%s1385_s2 + $0x110] sm:$0xff] }
  0x11   : > { %331 = vmatpush1.msra.mxu0 %v309_v4  ;;  %866 = vmatprep.mubr.msk.f32.mxu1 %vm413_vm1, %v1017_v9  ;;  %v304_v23 = vld [vmem:[%s1385_s2 + $0x40] sm:$0xff]  ;;  %v303_v25 = vld [vmem:[%s1385_s2 + $0x38] sm:$0xff]  ;;  %v816_v26 = vld [vmem:[%s1385_s2 + $0x108] sm:$0xff]  ;;  %v270_v52 = vrot.slane %v1013_v7, 1  ;;  %v232_v3 = vand.u32 15, %v226_v1  ;;  %v227_v4 = vadd.s32 8, %v226_v1 }
  0x12   : > { %867 = vmatmul.mubr.msk.f32.vlgmr.msra.gmra.mxu1 %vm413_vm1, %v1025_v13  ;;  %332 = vmatprep.subr.mxu0 %v943_v2  ;;  %v1039_v16 = vsel %vm269_vm2, %v271_v12, 0.0  ;;  %v1044_v17 = vsel %vm254_vm3, %v255_v10, %v256_v11  ;;  %v302_v27 = vld [vmem:[%s1385_s2 + $0x30] sm:$0xff]  ;;  %v815_v28 = vld [vmem:[%s1385_s2 + $0x100] sm:$0xff]  ;;  %v301_v29 = vld [vmem:[%s1385_s2 + $0x28] sm:$0xff] }
  0x13   : > { %523 = vmatpush1.msra.mxu1 %v822_v5  ;;  %333 = vmatpush1.msra.mxu0 %v308_v6  ;;  %v814_v30 = vld [vmem:[%s1385_s2 + $0xf8] sm:$0xff]  ;;  %v300_v31 = vld [vmem:[%s1385_s2 + $0x20] sm:$0xff]  ;;  %v813_v32 = vld [vmem:[%s1385_s2 + $0xf0] sm:$0xff]  ;;  %v1207_v58 = vsel %vm269_vm2, %v270_v52, %v271_v12  ;;  %v260_v5 = vsel %vm254_vm3, 0.0, %v255_v10  ;;  %vm261_vm5 = vcmp.ge.s32.totalorder %v232_v3, 1  ;;  %v239_v6 = vand.u32 15, %v227_v4 }
  0x14   : > { %524 = vmatprep.subr.mxu1 %v943_v2  ;;  %334 = vmatprep.subr.mxu0 %v943_v2  ;;  %v299_v33 = vld [vmem:[%s1385_s2 + $0x18] sm:$0xff]  ;;  %v812_v34 = vld [vmem:[%s1385_s2 + $0xe8] sm:$0xff]  ;;  %v298_v35 = vld [vmem:[%s1385_s2 + $0x10] sm:$0xff] }
  0x15   : > { %286 = vrot.lane.b32.xlu0 %v1015_v8, %s944_s11  ;;  %525 = vmatpush1.msra.mxu1 %v821_v14  ;;  %v811_v36 = vld [vmem:[%s1385_s2 + $0xe0] sm:$0xff]  ;;  %v297_v37 = vld [vmem:[%s1385_s2 + $0x8] sm:$0xff]  ;;  %v810_v38 = vld [vmem:[%s1385_s2 + $0xd8] sm:$0xff]  ;;  %v267_v8 = vsel %vm261_vm5, %v260_v5, 0.0  ;;  %vm277_vm6 = vcmp.lt.s32.totalorder %v239_v6, 15 }
  0x16   : > { %526 = vmatprep.subr.mxu1 %v943_v2  ;;  %335 = vmatpush1.msra.mxu0 %v307_v15  ;;  %v296_v39 = vld [vmem:[%s1385_s2] sm:$0xff]  ;;  %v809_v40 = vld [vmem:[%s1385_s2 + $0xd0] sm:$0xff]  ;;  %v319_v41 = vld [vmem:[%s1385_s2 + $0xb8] sm:$0xff] }
  0x17   : > { %527 = vmatpush1.msra.mxu1 %v820_v18  ;;  %336 = vmatprep.subr.mxu0 %v943_v2  ;;  %v808_v42 = vld [vmem:[%s1385_s2 + $0xc8] sm:$0xff]  ;;  %v318_v43 = vld [vmem:[%s1385_s2 + $0xb0] sm:$0xff]  ;;  %v807_v44 = vld [vmem:[%s1385_s2 + $0xc0] sm:$0xff] }
  0x18   : > { %528 = vmatprep.subr.mxu1 %v943_v2  ;;  %337 = vmatpush1.msra.mxu0 %v306_v19  ;;  %v317_v45 = vld [vmem:[%s1385_s2 + $0xa8] sm:$0xff]  ;;  %v830_v46 = vld [vmem:[%s1385_s2 + $0x178] sm:$0xff]  ;;  %v316_v47 = vld [vmem:[%s1385_s2 + $0xa0] sm:$0xff] }
  0x19   : > { %529 = vmatpush1.msra.mxu1 %v819_v20  ;;  %338 = vmatprep.subr.mxu0 %v943_v2  ;;  %v829_v48 = vld [vmem:[%s1385_s2 + $0x170] sm:$0xff]  ;;  %v315_v49 = vld [vmem:[%s1385_s2 + $0x98] sm:$0xff]  ;;  %v828_v50 = vld [vmem:[%s1385_s2 + $0x168] sm:$0xff] }
  0x1a   : > { %530 = vmatprep.subr.mxu1 %v943_v2  ;;  %339 = vmatpush1.msra.mxu0 %v305_v21  ;;  %v314_v51 = vld [vmem:[%s1385_s2 + $0x90] sm:$0xff]  ;;  %v827_v53 = vld [vmem:[%s1385_s2 + $0x160] sm:$0xff]  ;;  %v313_v54 = vld [vmem:[%s1385_s2 + $0x88] sm:$0xff] }
  0x1b   : > { %531 = vmatpush1.msra.mxu1 %v818_v22  ;;  %340 = vmatprep.subr.mxu0 %v943_v2  ;;  %v826_v55 = vld [vmem:[%s1385_s2 + $0x158] sm:$0xff]  ;;  %v312_v56 = vld [vmem:[%s1385_s2 + $0x80] sm:$0xff]  ;;  %v825_v57 = vld [vmem:[%s1385_s2 + $0x150] sm:$0xff] }
  0x1c   : > { %532 = vmatprep.subr.mxu1 %v943_v2  ;;  %341 = vmatpush1.msra.mxu0 %v304_v23  ;;  %v824_v59 = vld [vmem:[%s1385_s2 + $0x148] sm:$0xff]  ;;  %v823_v60 = vld [vmem:[%s1385_s2 + $0x140] sm:$0xff]  ;;  %v848_v12 = vld [vmem:[%s1385_s2 + $0x1f8] sm:$0xff] }
  0x1d   : > { %533 = vmatpush1.msra.mxu1 %v817_v24  ;;  %342 = vmatprep.subr.mxu0 %v943_v2  ;;  %v847_v7 = vld [vmem:[%s1385_s2 + $0x1f0] sm:$0xff]  ;;  %v846_v15 = vld [vmem:[%s1385_s2 + $0x1e8] sm:$0xff]  ;;  %v841_v20 = vld [vmem:[%s1385_s2 + $0x1c0] sm:$0xff] }
  0x1e   : > { %534 = vmatprep.subr.mxu1 %v943_v2  ;;  %343 = vmatpush1.msra.mxu0 %v303_v25  ;;  %v843_v18 = vld [vmem:[%s1385_s2 + $0x1d0] sm:$0xff]  ;;  %v842_v19 = vld [vmem:[%s1385_s2 + $0x1c8] sm:$0xff]  ;;  %v840_v21 = vld [vmem:[%s1385_s2 + $0x1b8] sm:$0xff] }
  0x1f   : > { %535 = vmatpush1.msra.mxu1 %v816_v26  ;;  %344 = vmatprep.subr.mxu0 %v943_v2  ;;  %v839_v22 = vld [vmem:[%s1385_s2 + $0x1b0] sm:$0xff]  ;;  %v838_v23 = vld [vmem:[%s1385_s2 + $0x1a8] sm:$0xff]  ;;  %v837_v24 = vld [vmem:[%s1385_s2 + $0x1a0] sm:$0xff] }
  0x20   : > { %536 = vmatprep.subr.mxu1 %v943_v2  ;;  %345 = vmatpush1.msra.mxu0 %v302_v27  ;;  %v836_v25 = vld [vmem:[%s1385_s2 + $0x198] sm:$0xff]  ;;  %v835_v26 = vld [vmem:[%s1385_s2 + $0x190] sm:$0xff]  ;;  %v834_v27 = vld [vmem:[%s1385_s2 + $0x188] sm:$0xff] }
  0x21   : > { %537 = vmatpush1.msra.mxu1 %v815_v28  ;;  %346 = vmatprep.subr.mxu0 %v943_v2  ;;  %v833_v28 = vld [vmem:[%s1385_s2 + $0x180] sm:$0xff] }
  0x22   : > { %538 = vmatprep.subr.mxu1 %v943_v2  ;;  %347 = vmatpush1.msra.mxu0 %v301_v29  ;;  %v856_v29 = vld [vmem:[%s1385_s2 + $0x238] sm:$0xff] }
  0x23   : > { %539 = vmatpush1.msra.mxu1 %v814_v30  ;;  %348 = vmatprep.subr.mxu0 %v943_v2  ;;  %v855_v30 = vld [vmem:[%s1385_s2 + $0x230] sm:$0xff] }
  0x24   : > { %540 = vmatprep.subr.mxu1 %v943_v2  ;;  %349 = vmatpush1.msra.mxu0 %v300_v31  ;;  %v854_v31 = vld [vmem:[%s1385_s2 + $0x228] sm:$0xff] }
  0x25   : > { %541 = vmatpush1.msra.mxu1 %v813_v32  ;;  %350 = vmatprep.subr.mxu0 %v943_v2  ;;  %v853_v32 = vld [vmem:[%s1385_s2 + $0x220] sm:$0xff] }
  0x26   : > { %542 = vmatprep.subr.mxu1 %v943_v2  ;;  %351 = vmatpush1.msra.mxu0 %v299_v33  ;;  %v852_v33 = vld [vmem:[%s1385_s2 + $0x218] sm:$0xff] }
  0x27   : > { %543 = vmatpush1.msra.mxu1 %v812_v34  ;;  %352 = vmatprep.subr.mxu0 %v943_v2  ;;  %v851_v34 = vld [vmem:[%s1385_s2 + $0x210] sm:$0xff] }
  0x28   : > { %544 = vmatprep.subr.mxu1 %v943_v2  ;;  %353 = vmatpush1.msra.mxu0 %v298_v35  ;;  %v850_v35 = vld [vmem:[%s1385_s2 + $0x208] sm:$0xff] }
  0x29   : > { %545 = vmatpush1.msra.mxu1 %v811_v36  ;;  %354 = vmatprep.subr.mxu0 %v943_v2  ;;  %v849_v36 = vld [vmem:[%s1385_s2 + $0x200] sm:$0xff] }
  0x2a   : > { %546 = vmatprep.subr.mxu1 %v943_v2  ;;  %355 = vmatpush1.msra.mxu0 %v297_v37 }
  0x2b   : > { %547 = vmatpush1.msra.mxu1 %v810_v38  ;;  %356 = vmatprep.subr.mxu0 %v943_v2 }
  0x2c   : > { %548 = vmatprep.subr.mxu1 %v943_v2  ;;  %357 = vmatpush1.msra.mxu0 %v296_v39 }
  0x2d   : > { %549 = vmatpush1.msra.mxu1 %v809_v40  ;;  %374 = vmatprep.subr.mxu0 %v943_v2 }
  0x2e   : > { %550 = vmatprep.subr.mxu1 %v943_v2  ;;  %375 = vmatpush2.msra.mxu0 %v319_v41 }
  0x2f   : > { %551 = vmatpush1.msra.mxu1 %v808_v42  ;;  %376 = vmatprep.subr.mxu0 %v943_v2 }
  0x30   : > { %552 = vmatprep.subr.mxu1 %v943_v2  ;;  %377 = vmatpush2.msra.mxu0 %v318_v43 }
  0x31   : > { %553 = vmatpush1.msra.mxu1 %v807_v44  ;;  %378 = vmatprep.subr.mxu0 %v943_v2 }
  0x32   : > { %570 = vmatprep.subr.mxu1 %v943_v2  ;;  %379 = vmatpush2.msra.mxu0 %v317_v45 }
  0x33   : > { %571 = vmatpush2.msra.mxu1 %v830_v46  ;;  %380 = vmatprep.subr.mxu0 %v943_v2 }
  0x34   : > { %572 = vmatprep.subr.mxu1 %v943_v2  ;;  %381 = vmatpush2.msra.mxu0 %v316_v47 }
  0x35   : > { %573 = vmatpush2.msra.mxu1 %v829_v48  ;;  %382 = vmatprep.subr.mxu0 %v943_v2 }
  0x36   : > { %574 = vmatprep.subr.mxu1 %v943_v2  ;;  %383 = vmatpush2.msra.mxu0 %v315_v49 }
  0x37   : > { %575 = vmatpush2.msra.mxu1 %v828_v50  ;;  %384 = vmatprep.subr.mxu0 %v943_v2 }
  0x38   : > { %576 = vmatprep.subr.mxu1 %v943_v2  ;;  %385 = vmatpush2.msra.mxu0 %v314_v51 }
  0x39   : > { %577 = vmatpush2.msra.mxu1 %v827_v53  ;;  %386 = vmatprep.subr.mxu0 %v943_v2 }
  0x3a   : > { %578 = vmatprep.subr.mxu1 %v943_v2  ;;  %387 = vmatpush2.msra.mxu0 %v313_v54 }
  0x3b   : > { %579 = vmatpush2.msra.mxu1 %v826_v55  ;;  %388 = vmatprep.subr.mxu0 %v943_v2 }
  0x3c   : > { %580 = vmatprep.subr.mxu1 %v943_v2  ;;  %389 = vmatpush2.msra.mxu0 %v312_v56 }
  0x3d   : > { %581 = vmatpush2.msra.mxu1 %v825_v57  ;;  %802 = vmatprep.mubr.msk.f32.mxu0 %vm290_vm4, %v1207_v58 }
  0x3e   : > { %582 = vmatprep.subr.mxu1 %v943_v2  ;;  %831 = vmatprep.mubr.msk.f32.mxu1 %vm290_vm4, %v1207_v58 }
  0x3f   : > { %583 = vmatpush2.msra.mxu1 %v824_v59  ;;  %634 = vmatprep.subr.mxu0 %v943_v2 }
  0x40   : > { %584 = vmatprep.subr.mxu1 %v943_v2  ;;  %403 = vperm.xlu1 %930, %v1017_v9  }
  0x41   : > { %585 = vmatpush2.msra.mxu1 %v823_v60  ;;  %931 = vset.pattern.permute.xlu0 %v946_v62 }
  0x42   : > { %869 = vmatprep.subr.mxu1 %v943_v2  ;;  %598 = vperm.xlu0 %931, %v1017_v9  }
  0x44   : > { %408 = vperm.xlu1 %930, %v1025_v13  }
  0x46   : > { %934 = vset.pattern.permute.xlu0 %v947_v63 }
  0x47   : > { %714 = vperm.xlu0 %934, %v1025_v13  }
  0x48   : > { %932 = vset.pattern.permute.xlu1 %v946_v62 }
  0x49   : > { %602 = vperm.xlu1 %932, %v1025_v13  }
  0x4d   : > { %933 = vset.pattern.permute.xlu1 %v947_v63 }
  0x4e   : > { %710 = vperm.xlu1 %933, %v1017_v9   ;;  %v1246_v9 = vsel %vm277_vm6, %v1039_v16, 0.0  ;;  %v845_v16 = vld [vmem:[%s1385_s2 + $0x1e0] sm:$0xff] }
  0x82   : > { %v285_v11 = vpop.permute.xlu0 %284 }
  0x83   : > { %v1238_v13 = vsel %vm290_vm4, %v267_v8, %v285_v11 }
  0x84   : > { %391 = vmatmul.mubr.f32.vlgmr.msra.gmra.mxu0 %v1238_v13  ;;  %587 = vmatmul.mubr.f32.vlgmr.msra.gmra.mxu1 %v1238_v13 }
  0x85   : > { %635 = vmatpush1.msra.mxu0 %v848_v12  ;;  %893 = vmatpush1.msra.mxu1 %v848_v12 }
  0x86   : > { %636 = vmatprep.subr.mxu0 %v943_v2  ;;  %870 = vmatprep.subr.mxu1 %v943_v2 }
  0x87   : > { %v287_v10 = vpop.permute.xlu0 %286  ;;  %637 = vmatpush1.msra.mxu0 %v847_v7  ;;  %894 = vmatpush1.msra.mxu1 %v847_v7 }
  0x88   : > { %v1252_v14 = vsel %vm290_vm4, %v1044_v17, %v287_v10  ;;  %803 = vmatprep.mubr.msk.f32.mxu0 %vm290_vm4, %v1246_v9  ;;  %638 = vmatprep.subr.mxu0 %v943_v2  ;;  %v844_v17 = vld [vmem:[%s1385_s2 + $0x1d8] sm:$0xff] }
  0x89   : > { %871 = vmatprep.subr.mxu1 %v943_v2  ;;  %396 = vmatmul.mubr.f32.gmra.mxu0 %v1252_v14 }
  0x8a   : > { %639 = vmatpush1.msra.mxu0 %v846_v15  ;;  %895 = vmatpush1.msra.mxu1 %v846_v15 }
  0x8b   : > { %832 = vmatprep.mubr.msk.f32.mxu1 %vm290_vm4, %v1246_v9  ;;  %640 = vmatprep.subr.mxu0 %v943_v2 }
  0x8c   : > { %872 = vmatprep.subr.mxu1 %v943_v2  ;;  %592 = vmatmul.mubr.f32.gmra.mxu1 %v1252_v14 }
  0x8d   : > { %641 = vmatpush1.msra.mxu0 %v845_v16  ;;  %896 = vmatpush1.msra.mxu1 %v845_v16 }
  0x8e   : > { %642 = vmatprep.subr.mxu0 %v943_v2  ;;  %873 = vmatprep.subr.mxu1 %v943_v2 }
  0x8f   : > { %643 = vmatpush1.msra.mxu0 %v844_v17  ;;  %897 = vmatpush1.msra.mxu1 %v844_v17 }
  0x90   : > { %644 = vmatprep.subr.mxu0 %v943_v2  ;;  %874 = vmatprep.subr.mxu1 %v943_v2 }
  0x91   : > { %645 = vmatpush1.msra.mxu0 %v843_v18  ;;  %898 = vmatpush1.msra.mxu1 %v843_v18 }
  0x92   : > { %646 = vmatprep.subr.mxu0 %v943_v2  ;;  %875 = vmatprep.subr.mxu1 %v943_v2 }
  0x93   : > { %647 = vmatpush1.msra.mxu0 %v842_v19  ;;  %899 = vmatpush1.msra.mxu1 %v842_v19 }
  0x94   : > { %648 = vmatprep.subr.mxu0 %v943_v2  ;;  %876 = vmatprep.subr.mxu1 %v943_v2 }
  0x95   : > { %649 = vmatpush1.msra.mxu0 %v841_v20  ;;  %900 = vmatpush1.msra.mxu1 %v841_v20 }
  0x96   : > { %650 = vmatprep.subr.mxu0 %v943_v2  ;;  %877 = vmatprep.subr.mxu1 %v943_v2 }
  0x97   : > { %651 = vmatpush1.msra.mxu0 %v840_v21  ;;  %901 = vmatpush1.msra.mxu1 %v840_v21 }
  0x98   : > { %652 = vmatprep.subr.mxu0 %v943_v2  ;;  %878 = vmatprep.subr.mxu1 %v943_v2 }
  0x99   : > { %653 = vmatpush1.msra.mxu0 %v839_v22  ;;  %902 = vmatpush1.msra.mxu1 %v839_v22 }
  0x9a   : > { %654 = vmatprep.subr.mxu0 %v943_v2  ;;  %879 = vmatprep.subr.mxu1 %v943_v2 }
  0x9b   : > { %655 = vmatpush1.msra.mxu0 %v838_v23  ;;  %903 = vmatpush1.msra.mxu1 %v838_v23 }
  0x9c   : > { %656 = vmatprep.subr.mxu0 %v943_v2  ;;  %880 = vmatprep.subr.mxu1 %v943_v2 }
  0x9d   : > { %657 = vmatpush1.msra.mxu0 %v837_v24  ;;  %904 = vmatpush1.msra.mxu1 %v837_v24 }
  0x9e   : > { %658 = vmatprep.subr.mxu0 %v943_v2  ;;  %881 = vmatprep.subr.mxu1 %v943_v2 }
  0x9f   : > { %659 = vmatpush1.msra.mxu0 %v836_v25  ;;  %905 = vmatpush1.msra.mxu1 %v836_v25 }
  0xa0   : > { %660 = vmatprep.subr.mxu0 %v943_v2  ;;  %882 = vmatprep.subr.mxu1 %v943_v2 }
  0xa1   : > { %661 = vmatpush1.msra.mxu0 %v835_v26  ;;  %906 = vmatpush1.msra.mxu1 %v835_v26 }
  0xa2   : > { %662 = vmatprep.subr.mxu0 %v943_v2  ;;  %883 = vmatprep.subr.mxu1 %v943_v2 }
  0xa3   : > { %663 = vmatpush1.msra.mxu0 %v834_v27  ;;  %907 = vmatpush1.msra.mxu1 %v834_v27 }
  0xa4   : > { %664 = vmatprep.subr.mxu0 %v943_v2  ;;  %884 = vmatprep.subr.mxu1 %v943_v2 }
  0xa5   : > { %665 = vmatpush1.msra.mxu0 %v833_v28  ;;  %908 = vmatpush1.msra.mxu1 %v833_v28 }
  0xa6   : > { %682 = vmatprep.subr.mxu0 %v943_v2  ;;  %885 = vmatprep.subr.mxu1 %v943_v2 }
  0xa7   : > { %683 = vmatpush2.msra.mxu0 %v856_v29  ;;  %909 = vmatpush2.msra.mxu1 %v856_v29 }
  0xa8   : > { %684 = vmatprep.subr.mxu0 %v943_v2  ;;  %886 = vmatprep.subr.mxu1 %v943_v2 }
  0xa9   : > { %685 = vmatpush2.msra.mxu0 %v855_v30  ;;  %910 = vmatpush2.msra.mxu1 %v855_v30 }
  0xaa   : > { %686 = vmatprep.subr.mxu0 %v943_v2  ;;  %887 = vmatprep.subr.mxu1 %v943_v2 }
  0xab   : > { %687 = vmatpush2.msra.mxu0 %v854_v31  ;;  %911 = vmatpush2.msra.mxu1 %v854_v31 }
  0xac   : > { %688 = vmatprep.subr.mxu0 %v943_v2  ;;  %888 = vmatprep.subr.mxu1 %v943_v2 }
  0xad   : > { %689 = vmatpush2.msra.mxu0 %v853_v32  ;;  %912 = vmatpush2.msra.mxu1 %v853_v32 }
  0xae   : > { %690 = vmatprep.subr.mxu0 %v943_v2  ;;  %889 = vmatprep.subr.mxu1 %v943_v2 }
  0xaf   : > { %691 = vmatpush2.msra.mxu0 %v852_v33  ;;  %913 = vmatpush2.msra.mxu1 %v852_v33 }
  0xb0   : > { %692 = vmatprep.subr.mxu0 %v943_v2  ;;  %890 = vmatprep.subr.mxu1 %v943_v2 }
  0xb1   : > { %693 = vmatpush2.msra.mxu0 %v851_v34  ;;  %914 = vmatpush2.msra.mxu1 %v851_v34 }
  0xb2   : > { %694 = vmatprep.subr.mxu0 %v943_v2  ;;  %891 = vmatprep.subr.mxu1 %v943_v2 }
  0xb3   : > { %695 = vmatpush2.msra.mxu0 %v850_v35  ;;  %915 = vmatpush2.msra.mxu1 %v850_v35 }
  0xb4   : > { %696 = vmatprep.subr.mxu0 %v943_v2  ;;  %892 = vmatprep.subr.mxu1 %v943_v2 }
  0xb5   : > { %697 = vmatpush2.msra.mxu0 %v849_v36  ;;  %916 = vmatpush2.msra.mxu1 %v849_v36 }
  0xb6   : > { %857 = vmatprep.mubr.msk.f32.mxu0 %vm290_vm4, %v1207_v58  ;;  %858 = vmatprep.mubr.msk.f32.mxu1 %vm290_vm4, %v1246_v9 }
  0xb7   : > { %699 = vmatmul.mubr.f32.vlgmr.msra.gmra.mxu0 %v1238_v13  ;;  %704 = vmatmul.mubr.f32.vlgmr.msra.gmra.mxu1 %v1252_v14 }
  0xbb   : > { %v404_v46 = vpop.permute.xlu1 %403 }
  0xbd   : > { %v599_v50 = vpop.permute.xlu0 %598 }
  0xbf   : > { %v409_v47 = vpop.permute.xlu1 %408 }
  0xc2   : > { %v715_v56 = vpop.permute.xlu0 %714 }
  0xc4   : > { %v603_v51 = vpop.permute.xlu1 %602 }
  0xc9   : > { %v711_v55 = vpop.permute.xlu1 %710 }
  0xd2   : > { %v868_v37 = vpop.f32.mrf.mxu1 }
  0xd4   : > { %v488_v38 = vpop.f32.mrf.mxu1 }
 0x144   : > { %v392_v39 = vpop.f32.mrf.mxu0  ;;  %v588_v40 = vpop.f32.mrf.mxu1 }
 0x145   : > { %v411_v48 = vmul.f32 %v404_v46, %v392_v39  ;;  %v605_v57 = vmul.f32 %v599_v50, %v588_v40 }
 0x146   : > { %v394_v41 = vpop.f32.mrf.mxu0  ;;  %v590_v42 = vpop.f32.mrf.mxu1 }
 0x147   : > { %v489_v52 = vadd.f32 %v488_v38, %v411_v48 }
 0x149   : > { %v397_v43 = vpop.f32.mrf.mxu0  ;;  %v607_v60 = vadd.f32 %v605_v57, %v489_v52 }
 0x14a   : > { %v412_v49 = vmul.f32 %v409_v47, %v397_v43 }
 0x14b   : > { %v399_v2 = vpop.f32.mrf.mxu0 }
 0x14c   : > { %v593_v44 = vpop.f32.mrf.mxu1  ;;  %v494_v53 = vadd.f32 %v868_v37, %v412_v49 }
 0x14d   : > { %v606_v54 = vmul.f32 %v603_v51, %v593_v44 }
 0x14e   : > { %v595_v45 = vpop.f32.mrf.mxu1 }
 0x14f   : > { %v608_v61 = vadd.f32 %v606_v54, %v494_v53 }
 0x177   : > { %v700_v58 = vpop.f32.mrf.mxu0  ;;  %v705_v59 = vpop.f32.mrf.mxu1 }
 0x178   : > { %v717_v62 = vmul.f32 %v711_v55, %v700_v58  ;;  %v718_v63 = vmul.f32 %v715_v56, %v705_v59 }
 0x179   : > { %v702_v0 = vpop.f32.mrf.mxu0  ;;  %v707_v1 = vpop.f32.mrf.mxu1 }
 0x17a   : > { %v719_v3 = vadd.f32 %v717_v62, %v607_v60  ;;  %v720_v4 = vadd.f32 %v718_v63, %v608_v61 }
 0x17c   : > { %721 = vst [vmem:[%s221_s30] sm:$0xff] %v719_v3  ;;  %722 = vst [vmem:[%s221_s30 + $0x8] sm:$0xff] %v720_v4 }
 0x17d PF: > { %s14_s15 = sadd.s32 1, %s941_s15  }
 0x17e   : > { %p11_p4 = scmp.ge.s32.totalorder %s14_s15, 4  }
 0x180   :  { %13 = sbr.rel (!%p11_p4) target bundleno = 1 (0x1), region = 71 }

</bundles_post_ra>
